<compile_context>
chip_gen: v6e
topology: v6e:2x2x1
jax: 0.10.0
libtpu: 0.0.40
codegen_flags: <defaults>
</compile_context>

<pallas_src>
import functools
import math

import jax
import jax.numpy as jnp
from jax.experimental import pallas as pl
from jax.experimental.pallas import tpu as pltpu


def _vmem_limit_bytes():
    """Chip-aware scoped-VMEM budget: ~3/4 of physical VMEM."""
    try:
        cap = int(pltpu.get_tpu_info().vmem_capacity_bytes)
        return cap * 3 // 4
    except Exception:
        return None


_VMEM_LIMIT = _vmem_limit_bytes()


def _choose_tile(n, max_tile, align):
    """Largest tile <= max_tile that divides n, preferring multiples of align.
    Returns n itself when n <= max_tile (full-dim block)."""
    if n <= max_tile:
        return n
    t = (max_tile // align) * align
    while t >= align:
        if n % t == 0:
            return t
        t -= align
    for t in range(max_tile, 0, -1):      # no aligned divisor: any divisor
        if n % t == 0:
            return t
    return n


def _fit_tiles(nq, nk, d_k, d_v, aw_itemsize, need_weights,
               block_q, block_k, vmem_limit):
    """Pick (tq, tk) and shrink them until the double-buffered working set
    (dominated by the aw tile) fits the scoped-VMEM budget."""
    budget = int(0.8 * (vmem_limit if vmem_limit else 48 * 1024 * 1024))
    tq = _choose_tile(nq, block_q, 8)
    tk = _choose_tile(nk, block_k, 128)

    def est(tq, tk):
        b = 2 * tq * d_k * tk * aw_itemsize           # aw (double-buffered)
        b += tq * d_k * tk * 4                        # gbias product temporary
        b += 2 * d_k * tk * 4 + 2 * tk * d_v * 4      # k, v
        b += 2 * 2 * tq * d_k * 4                     # q, gq
        b += 2 * tq * d_v * 4 + tq * (d_v + 2) * 4    # ctx out + scratch
        if need_weights:
            b += 2 * tq * nk * 4                      # resident att tile
        return b

    while est(tq, tk) > budget and tq > 8:
        new_tq = _choose_tile(nq, max(tq // 2, 8), 8)
        if new_tq == tq:
            break
        tq = new_tq
    while est(tq, tk) > budget and tk > 128:
        new_tk = _choose_tile(nk, max(tk // 2, 128), 128)
        if new_tk == tk:
            break
        tk = new_tk
    return tq, tk


# ----------------------------------------------------------------------------
# Linear (projection) kernel: y = x @ W + b, tiled over rows (M).
# ----------------------------------------------------------------------------
def _linear_kernel(x_ref, w_ref, b_ref, o_ref):
    o_ref[...] = (
        jnp.dot(x_ref[...], w_ref[...], preferred_element_type=jnp.float32)
        + b_ref[...]
    ).astype(o_ref.dtype)


def linear(x, w, b, *, block_m=512):
    """x: (M, d_in), w: (d_in, d_out), b: (d_out,) -> (M, d_out)."""
    m, d_in = x.shape
    d_out = w.shape[1]
    bm = _choose_tile(m, block_m, 8)
    return pl.pallas_call(
        _linear_kernel,
        out_shape=jax.ShapeDtypeStruct((m, d_out), x.dtype),
        grid=(m // bm,),
        in_specs=[
            pl.BlockSpec((bm, d_in), lambda i: (i, 0)),
            pl.BlockSpec((d_in, d_out), lambda i: (0, 0)),
            pl.BlockSpec((1, d_out), lambda i: (0, 0)),
        ],
        out_specs=pl.BlockSpec((bm, d_out), lambda i: (i, 0)),
        compiler_params=pltpu.CompilerParams(
            dimension_semantics=("parallel",),
            vmem_limit_bytes=_VMEM_LIMIT),
    )(x, w, b.reshape(1, d_out))


# ----------------------------------------------------------------------------
# Attention core kernel.  Grid = (batch, head, q-block, k-block); the k-block
# axis is a reduction handled with an online-softmax accumulator in VMEM.
# ----------------------------------------------------------------------------
def _rpe_attn_kernel(*refs, scale, tk, has_mask, need_weights):
    q_ref, k_ref, v_ref, gq_ref, aw_ref = refs[:5]
    i = 5
    mask_ref = None
    if has_mask:
        mask_ref = refs[i]; i += 1
    ctx_ref = refs[i]; i += 1
    att_ref = None
    if need_weights:
        att_ref = refs[i]; i += 1
    m_scr, l_scr, acc_scr = refs[i], refs[i + 1], refs[i + 2]

    kb = pl.program_id(3)
    nkb = pl.num_programs(3)

    @pl.when(kb == 0)
    def _():
        m_scr[...] = jnp.full_like(m_scr, -jnp.inf)
        l_scr[...] = jnp.zeros_like(l_scr)
        acc_scr[...] = jnp.zeros_like(acc_scr)

    # 1/sqrt(d_k) folded into q (tq x d_k) instead of the (tq x tk) scores.
    q = q_ref[...].astype(jnp.float32) * scale                  # (tq, d_k)
    gq = gq_ref[...].astype(jnp.float32)                        # (tq, d_k)

    # k arrives pre-transposed (d_k, tk): MXU RHS in native (K, N) form.
    s = jnp.dot(q, k_ref[...].astype(jnp.float32),
                preferred_element_type=jnp.float32)             # (tq, tk)

    # geometric bias: sum_d aw[q, d, k] * gq[q, d].  aw is upcast per-tile so
    # the HBM stream stays in its narrow dtype; nk on lanes -> sublane reduce.
    aw = aw_ref[...].astype(jnp.float32)                        # (tq, d_k, tk)
    s = s + jnp.sum(aw * gq[:, :, None], axis=1)

    if has_mask:
        s = jnp.where(mask_ref[...] != 0, jnp.float32(-1000000000.0), s)

    if need_weights:
        # stream raw (masked) scores into the resident att output tile; the
        # normalization happens once on the last k-block.
        off = pl.multiple_of(kb * tk, tk)
        att_ref[:, pl.ds(off, tk)] = s

    # online softmax over key blocks (flash-attention style)
    m_prev = m_scr[...]                                         # (tq, 1)
    m_new = jnp.maximum(m_prev, jnp.max(s, axis=-1, keepdims=True))
    alpha = jnp.exp(m_prev - m_new)
    p = jnp.exp(s - m_new)                                      # (tq, tk)
    l_scr[...] = alpha * l_scr[...] + jnp.sum(p, axis=-1, keepdims=True)
    acc_scr[...] = alpha * acc_scr[...] + jnp.dot(
        p.astype(v_ref.dtype), v_ref[...], preferred_element_type=jnp.float32)
    m_scr[...] = m_new

    @pl.when(kb == nkb - 1)
    def _():
        l = l_scr[...]
        inv_l = pl.reciprocal(l, approx=True)     # EUP slot, nearly free
        inv_l = inv_l * (2.0 - l * inv_l)         # 1 Newton step -> ~exact
        ctx_ref[...] = (acc_scr[...] * inv_l).astype(ctx_ref.dtype)
        if need_weights:
            att_ref[...] = (jnp.exp(att_ref[...] - m_scr[...]) * inv_l
                            ).astype(att_ref.dtype)


def rpe_attention(queries, keys, values, params, attention_weights,
                  attention_mask=None, *, h, d_k, d_v,
                  block_q=256, block_k=512, need_weights=True,
                  aw_pre_transposed=False):
    """Forward pass of RPEAttention. Returns (out, att) like the PyTorch
    module (att is None when need_weights=False).

    attention_weights: (b|1, h|1, nq, nk, d_k), or (b|1, h|1, nq, d_k, nk)
    when aw_pre_transposed=True (preferred: key axis already on TPU lanes and
    the wrapper-side relayout of the dominant HBM stream is avoided)."""
    b_s, nq, d_model = queries.shape
    nk = keys.shape[1]

    # ---- projections -------------------------------------------------------
    # fc_q and fc_gq both consume `queries`: fuse into one matmul so the
    # activations are read from HBM once and the output stays lane-dense.
    wqg = jnp.concatenate([params["wq"], params["wgq"]], axis=1)
    bqg = jnp.concatenate([params["bq"], params["bgq"]], axis=0)
    qgq = linear(queries.reshape(b_s * nq, d_model), wqg, bqg)
    q2d, gq2d = qgq[:, : h * d_k], qgq[:, h * d_k:]
    k2d = linear(keys.reshape(b_s * nk, d_model), params["wk"], params["bk"])
    v2d = linear(values.reshape(b_s * nk, d_model), params["wv"], params["bv"])

    # head-major layouts; k is pre-transposed to (b, h, d_k, nk).
    # TODO(synk): the (b, n, h, d) -> (b, h, ...) relayouts are still XLA
    # copies; folding them into the BlockSpecs would need size-1 sublane blocks.
    q = q2d.reshape(b_s, nq, h, d_k).transpose(0, 2, 1, 3)
    gq = gq2d.reshape(b_s, nq, h, d_k).transpose(0, 2, 1, 3)
    k = k2d.reshape(b_s, nk, h, d_k).transpose(0, 2, 3, 1)
    v = v2d.reshape(b_s, nk, h, d_v).transpose(0, 2, 1, 3)

    # ---- attention_weights: keep original dtype, key axis on lanes ---------
    aw = attention_weights
    if not aw_pre_transposed:
        assert aw.shape[-3:] == (nq, nk, d_k), \
            "attention_weights must be (b|1, h|1, nq, nk, d_k)"
        # TODO(synk): ideally the producer supplies aw already laid out as
        # (..., nq, d_k, nk); this swap costs one extra read+write of the
        # dominant HBM stream.
        aw = jnp.swapaxes(aw, -1, -2)
    assert aw.shape[-3:] == (nq, d_k, nk)
    ab, ah = aw.shape[0], aw.shape[1]

    # ---- tiles (auto-shrunk to the chip's scoped-VMEM budget) --------------
    tq, tk = _fit_tiles(nq, nk, d_k, d_v, aw.dtype.itemsize, need_weights,
                        block_q, block_k, _VMEM_LIMIT)
    nqb, nkb = nq // tq, nk // tk

    # broadcast over batch / head happens in the index_maps (no HBM copies).
    # TODO(synk): when ab == 1 or ah == 1 the identical aw block is still
    # re-streamed once per (batch, head); folding several heads into one grid
    # step would remove that factor from the memory-bound roofline.
    aw_spec = pl.BlockSpec(
        (None, None, tq, d_k, tk),
        lambda bi, hi, qi, kb: (bi if ab > 1 else 0, hi if ah > 1 else 0,
                                qi, 0, kb))

    in_arrays = [q, k, v, gq, aw]
    in_specs = [
        pl.BlockSpec((None, None, tq, d_k),
                     lambda bi, hi, qi, kb: (bi, hi, qi, 0)),
        pl.BlockSpec((None, None, d_k, tk),
                     lambda bi, hi, qi, kb: (bi, hi, 0, kb)),
        pl.BlockSpec((None, None, tk, d_v),
                     lambda bi, hi, qi, kb: (bi, hi, kb, 0)),
        pl.BlockSpec((None, None, tq, d_k),
                     lambda bi, hi, qi, kb: (bi, hi, qi, 0)),
        aw_spec,
    ]

    has_mask = attention_mask is not None
    if has_mask:
        mask = attention_mask
        if mask.ndim == 2:
            mask = mask[None, None]
        elif mask.ndim == 3:
            mask = mask[:, None]
        if mask.shape[2] != nq or mask.shape[3] != nk:
            mask = jnp.broadcast_to(mask, mask.shape[:2] + (nq, nk))
        mask = mask.astype(jnp.int32)  # small stream; batch/head not replicated
        mb, mh = mask.shape[0], mask.shape[1]
        in_arrays.append(mask)
        in_specs.append(pl.BlockSpec(
            (None, None, tq, tk),
            lambda bi, hi, qi, kb: (bi if mb > 1 else 0, hi if mh > 1 else 0,
                                    qi, kb)))

    out_shape = [jax.ShapeDtypeStruct((b_s, h, nq, d_v), jnp.float32)]
    out_specs = [pl.BlockSpec((None, None, tq, d_v),
                              lambda bi, hi, qi, kb: (bi, hi, qi, 0))]
    if need_weights:
        # the att output block doubles as the raw-score buffer (resident
        # across kb); no separate (nq, nk) scratch is allocated.
        out_shape.append(jax.ShapeDtypeStruct((b_s, h, nq, nk), jnp.float32))
        out_specs.append(pl.BlockSpec((None, None, tq, nk),
                                      lambda bi, hi, qi, kb: (bi, hi, qi, 0)))

    scratch_shapes = [
        pltpu.VMEM((tq, 1), jnp.float32),     # running max
        pltpu.VMEM((tq, 1), jnp.float32),     # running denominator
        pltpu.VMEM((tq, d_v), jnp.float32),   # output accumulator
    ]

    kernel = functools.partial(
        _rpe_attn_kernel,
        scale=1.0 / math.sqrt(d_k), tk=tk,
        has_mask=has_mask, need_weights=need_weights)

    outs = pl.pallas_call(
        kernel,
        out_shape=tuple(out_shape),
        grid=(b_s, h, nqb, nkb),
        in_specs=in_specs,
        out_specs=tuple(out_specs),
        scratch_shapes=scratch_shapes,
        compiler_params=pltpu.CompilerParams(
            dimension_semantics=("parallel", "parallel", "parallel",
                                 "arbitrary"),
            vmem_limit_bytes=_VMEM_LIMIT),
    )(*in_arrays)

    if need_weights:
        ctx, att = outs
    else:
        (ctx,) = outs
        att = None

    # (b, h, nq, d_v) -> (b, nq, h*d_v) -> fc_o
    out = ctx.transpose(0, 2, 1, 3).reshape(b_s * nq, h * d_v)
    out = linear(out, params["wo"], params["bo"]).reshape(b_s, nq, d_model)
    return out, att


# ----------------------------------------------------------------------------
# Pure-JAX reference (mirror of the PyTorch forward) for correctness check.
# ----------------------------------------------------------------------------
def ref_forward(queries, keys, values, params, aw, mask, *, h, d_k, d_v):
    b_s, nq, d_model = queries.shape
    nk = keys.shape[1]
    q = (queries @ params["wq"] + params["bq"]).reshape(
        b_s, nq, h, d_k).transpose(0, 2, 1, 3)
    k = (keys @ params["wk"] + params["bk"]).reshape(
        b_s, nk, h, d_k).transpose(0, 2, 3, 1)
    v = (values @ params["wv"] + params["bv"]).reshape(
        b_s, nk, h, d_v).transpose(0, 2, 1, 3)
    att = jnp.matmul(q, k) / math.sqrt(d_k)
    gq = (queries @ params["wgq"] + params["bgq"]).reshape(
        b_s, nq, h, d_k).transpose(0, 2, 1, 3)[..., None]
    gbias = jnp.matmul(aw, gq)[..., 0]
    att = att + gbias
    if mask is not None:
        att = jnp.where(mask.astype(bool), -1000000000.0, att)
    att = jax.nn.softmax(att, axis=-1)
    out = jnp.matmul(att, v).transpose(0, 2, 1, 3).reshape(b_s, nq, h * d_v)
    out = out @ params["wo"] + params["bo"]
    return out, att


def xavier_uniform(key, fan_in, fan_out):
    limit = math.sqrt(6.0 / (fan_in + fan_out))
    return jax.random.uniform(key, (fan_in, fan_out), jnp.float32, -limit, limit)


if __name__ == "__main__":
    b_s, nq, nk = 2, 8, 8
    d_model, d_k, d_v, h = 32, 8, 8, 4

    key = jax.random.PRNGKey(0)
    ks = jax.random.split(key, 12)

    params = {
        "wq": xavier_uniform(ks[0], d_model, h * d_k),
        "bq": jnp.zeros((h * d_k,), jnp.float32),
        "wk": xavier_uniform(ks[1], d_model, h * d_k),
        "bk": jnp.zeros((h * d_k,), jnp.float32),
        "wv": xavier_uniform(ks[2], d_model, h * d_v),
        "bv": jnp.zeros((h * d_v,), jnp.float32),
        "wo": xavier_uniform(ks[3], h * d_v, d_model),
        "bo": jnp.zeros((d_model,), jnp.float32),
        "wgq": xavier_uniform(ks[4], d_model, h * d_k),
        "bgq": jnp.zeros((h * d_k,), jnp.float32),
    }

    queries = jax.random.normal(ks[5], (b_s, nq, d_model), jnp.float32)
    keys_in = jax.random.normal(ks[6], (b_s, nk, d_model), jnp.float32)
    values = jax.random.normal(ks[7], (b_s, nk, d_model), jnp.float32)
    attention_weights = jax.random.normal(
        ks[8], (b_s, h, nq, nk, d_k), jnp.float32)
    attention_mask = (jax.random.uniform(
        ks[9], (b_s, 1, nq, nk)) > 0.8).astype(jnp.int32)

    # masked path, with attention-matrix output
    out, att = rpe_attention(queries, keys_in, values, params,
                             attention_weights, attention_mask,
                             h=h, d_k=d_k, d_v=d_v)
    jax.block_until_ready((out, att))
    out_ref, att_ref = ref_forward(queries, keys_in, values, params,
                                   attention_weights, attention_mask,
                                   h=h, d_k=d_k, d_v=d_v)
    assert jnp.allclose(out, out_ref, atol=1e-3, rtol=1e-3), "output mismatch"
    assert jnp.allclose(att, att_ref, atol=1e-4, rtol=1e-3), "attention mismatch"

    # masked path, context-only (no attention-matrix writeback)
    out_nw, att_nw = rpe_attention(queries, keys_in, values, params,
                                   attention_weights, attention_mask,
                                   h=h, d_k=d_k, d_v=d_v, need_weights=False)
    jax.block_until_ready(out_nw)
    assert att_nw is None
    assert jnp.allclose(out_nw, out_ref, atol=1e-3, rtol=1e-3), \
        "no-weights output mismatch"

    # mask-less path (mask DMA and select skipped entirely)
    out_nm, att_nm = rpe_attention(queries, keys_in, values, params,
                                   attention_weights, None,
                                   h=h, d_k=d_k, d_v=d_v)
    jax.block_until_ready((out_nm, att_nm))
    out_ref2, att_ref2 = ref_forward(queries, keys_in, values, params,
                                     attention_weights, None,
                                     h=h, d_k=d_k, d_v=d_v)
    assert jnp.allclose(out_nm, out_ref2, atol=1e-3, rtol=1e-3), \
        "no-mask output mismatch"
    assert jnp.allclose(att_nm, att_ref2, atol=1e-4, rtol=1e-3), \
        "no-mask attention mismatch"

    print("KERNEL_OK")
</pallas_src>

<mosaic_0001>
module attributes {stable_mosaic.version = 11 : i64} {
  func.func @_linear_kernel(%arg0: i32, %arg1: memref<16x32xf32, #tpu.memory_space<vmem>>, %arg2: memref<32x64xf32, #tpu.memory_space<vmem>>, %arg3: memref<1x64xf32, #tpu.memory_space<vmem>>, %arg4: memref<16x64xf32, #tpu.memory_space<vmem>>) attributes {dimension_semantics = [#tpu.dimension_semantics<parallel>], iteration_bounds = array<i64: 1>, scalar_prefetch = 0 : i64, scratch_operands = 0 : i64, tpu.core_type = #tpu.core_type<tc>, window_params = [{transform_indices = @transform_0, window_bounds = array<i64: 16, 32>}, {pipeline_mode = #tpu.pipeline_mode<synchronous>, transform_indices = @transform_1, window_bounds = array<i64: 32, 64>}, {pipeline_mode = #tpu.pipeline_mode<synchronous>, transform_indices = @transform_2, window_bounds = array<i64: 1, 64>}, {transform_indices = @transform_3, window_bounds = array<i64: 16, 64>}]} {
    %c0 = arith.constant 0 : index
    %c0_0 = arith.constant 0 : index
    %0 = vector.load %arg1[%c0, %c0_0] : memref<16x32xf32, #tpu.memory_space<vmem>>, vector<16x32xf32>
    %c0_1 = arith.constant 0 : index
    %c0_2 = arith.constant 0 : index
    %1 = vector.load %arg2[%c0_1, %c0_2] : memref<32x64xf32, #tpu.memory_space<vmem>>, vector<32x64xf32>
    %cst = arith.constant dense<0.000000e+00> : vector<16x64xf32>
    %2 = tpu.matmul %0, %1, %cst {dimension_numbers = #tpu.dot_dimension_numbers<[1], [0], [0], [1], [0, 0, 1, 1], [], []>} : vector<16x32xf32>, vector<32x64xf32>, vector<16x64xf32> -> vector<16x64xf32>
    %c0_3 = arith.constant 0 : index
    %c0_4 = arith.constant 0 : index
    %3 = vector.load %arg3[%c0_3, %c0_4] : memref<1x64xf32, #tpu.memory_space<vmem>>, vector<1x64xf32>
    %4 = vector.broadcast %3 : vector<1x64xf32> to vector<16x64xf32>
    %5 = arith.addf %2, %4 : vector<16x64xf32>
    %c0_5 = arith.constant 0 : index
    %c0_6 = arith.constant 0 : index
    %6 = vector.load %arg4[%c0_5, %c0_6] : memref<16x64xf32, #tpu.memory_space<vmem>>, vector<16x64xf32>
    tpu.vector_store %arg4[%c0_5, %c0_6], %5 {strides = array<i32>} : memref<16x64xf32, #tpu.memory_space<vmem>>, vector<16x64xf32>,
    return
  }
  func.func @transform_0(%arg0: i32) -> (i32, i32) {
    %c0_i32 = arith.constant 0 : i32
    %c0_i32_0 = arith.constant 0 : i32
    return %arg0, %c0_i32 : i32, i32
  }
  func.func @transform_1(%arg0: i32) -> (i32, i32) {
    %c0_i32 = arith.constant 0 : i32
    %c0_i32_0 = arith.constant 0 : i32
    %c0_i32_1 = arith.constant 0 : i32
    return %c0_i32, %c0_i32_0 : i32, i32
  }
  func.func @transform_2(%arg0: i32) -> (i32, i32) {
    %c0_i32 = arith.constant 0 : i32
    %c0_i32_0 = arith.constant 0 : i32
    %c0_i32_1 = arith.constant 0 : i32
    return %c0_i32, %c0_i32_0 : i32, i32
  }
  func.func @transform_3(%arg0: i32) -> (i32, i32) {
    %c0_i32 = arith.constant 0 : i32
    %c0_i32_0 = arith.constant 0 : i32
    return %arg0, %c0_i32 : i32, i32
  }
}

</mosaic_0001>

<bundles_post_ra>
// kernel: tpu_custom_call.1
= control target key start
LH: loop header
LB: loop body
LE: loop exit
PB: predicated region body
PF: predicated region fallthrough
CT: control target
= control target key end

     0   :  { %8 = vsyncpa [#allocation3], 0  ;;  %s298_s0 = inlined_call_operand.hbm [shape: f32[16,32], index: 0, kind: input, shape index: {}]   ;;  %s299_s1 = inlined_call_operand.hbm [shape: f32[32,64], index: 1, kind: input, shape index: {}]   ;;  %s300_s2 = inlined_call_operand.vmem [shape: f32[1,64], index: 2, kind: input, shape index: {}]   ;;  %s301_s3 = inlined_call_operand.hbm [shape: f32[16,64], index: 3, kind: output, shape index: {}]  }
   0x1   :  { %9 = vsyncpa [#allocation6], 0 }
   0x2   :  { %10 = vsyncpa [#allocation4], 0  ;;  %s250_s12 = smov [#allocation2]  }
   0x3   :  { %s16_s13 = sshll.u32 %s250_s12, 4  ;;  %s17_s13 = int_to_ptr.vmem [resolvable:$true] %s16_s13 }
   0x4   :  { %s192_s14 = scalar_lea.vmem %s17_s13, 256  ;;  %p197_p1 = scmp.lt.s32.totalorder %s17_s13, %s17_s13 }
   0x5   :  { %p193_p0 = scmp.ne.s32.totalorder %s17_s13, %s192_s14  ;;  %p198_p2 = scmp.lt.s32.totalorder %s192_s14, %s192_s14 }
   0x7   :  { %p199_p3 = por %p198_p2, %p197_p1 }
   0x9   :  { %p200_p4 = pnand %p199_p3, %p193_p0 }
   0xb   :  { %203 = shalt.err (!%p200_p4)
}
   0xc   :  { %s251_s15 = smov 128   ;;  %s252_s16 = smov 8  }
   0xd   :  { %22 = dma.hbm_to_vmem [thread:$0]  %s298_s0, 256, %s17_s13, [#allocation3], %s251_s15, %s251_s15, %s252_s16  }
   0xe   :  { %s253_s19 = smov [#allocation5]  }
   0xf   :  { %s28_s20 = sshll.u32 %s253_s19, 4  ;;  %s29_s20 = int_to_ptr.vmem [resolvable:$true] %s28_s20 }
  0x10   :  { %s212_s21 = scalar_lea.vmem %s29_s20, 512  ;;  %p217_p6 = scmp.lt.s32.totalorder %s29_s20, %s29_s20 }
  0x11   :  { %p213_p5 = scmp.ne.s32.totalorder %s29_s20, %s212_s21  ;;  %p218_p7 = scmp.lt.s32.totalorder %s212_s21, %s212_s21 }
  0x13   :  { %p219_p8 = por %p218_p7, %p217_p6 }
  0x15   :  { %p220_p9 = pnand %p219_p8, %p213_p5 }
  0x17   :  { %223 = shalt.err (!%p220_p9)
}
  0x18   :  { %34 = dma.hbm_to_vmem [thread:$0]  %s299_s1, 512, %s29_s20, [#allocation6], %s251_s15, %s251_s15, %s252_s16  }
  0x19   :  { %244 = dma.done.wait [#allocation3], 256  }
  0x1a   :  { %245 = vsyncadd [#allocation3], 4294967040 }
  0x1b   :  { %246 = dma.done.wait [#allocation6], 512  }
  0x1c   :  { %247 = vsyncadd [#allocation6], 4294966784  ;;  %vm56_vm0 = vcmask 261120   ;;  %v48_v0 = vld [vmem:[#allocation5 + $0x18] sm:$0xff]  ;;  %v47_v1 = vld [vmem:[#allocation5 + $0x10] sm:$0xff]  ;;  %vm138_vm1 = vcmask 523264  }
  0x1d   :  { %168 = vmatprep.subr.mxu0 %v48_v0  ;;  %v43_v2 = vld [vmem:[#allocation2] sm:$0xff]  ;;  %v46_v3 = vld [vmem:[#allocation5 + $0x8] sm:$0xff]  ;;  %v45_v4 = vld [vmem:[#allocation5] sm:$0xff]  ;;  %s254_s24 = smov [#allocation7]  }
  0x1e   :  { %169 = vmatpush3.msra.mxu0 %v48_v0  ;;  %176 = vmatprep.mubr.msk.f32.mxu0 %vm56_vm0, %v43_v2  ;;  %v44_v5 = vld [vmem:[#allocation2 + $0x8] sm:$0xff]  ;;  %v159_v6 = vld [vmem:[%s300_s2] ss:$0 sm:$0xff]  ;;  %s146_s25 = sshll.u32 %s254_s24, 4  ;;  %s147_s25 = int_to_ptr.vmem [resolvable:$true] %s146_s25 }
  0x1f   :  { %170 = vmatprep.subr.mxu0 %v47_v1  ;;  %s224_s26 = scalar_lea.vmem %s147_s25, 256  ;;  %p229_p11 = scmp.lt.s32.totalorder %s147_s25, %s147_s25 }
  0x20   :  { %171 = vmatpush3.msra.mxu0 %v47_v1  ;;  %p225_p10 = scmp.ne.s32.totalorder %s147_s25, %s224_s26  ;;  %p230_p12 = scmp.lt.s32.totalorder %s224_s26, %s224_s26 }
  0x21   :  { %172 = vmatprep.subr.mxu0 %v46_v3 }
  0x22   :  { %173 = vmatpush3.msra.mxu0 %v46_v3  ;;  %p231_p13 = por %p230_p12, %p229_p11 }
  0x23   :  { %174 = vmatprep.subr.mxu0 %v45_v4 }
  0x24   :  { %175 = vmatpush3.msra.mxu0 %v45_v4  ;;  %p232_p0 = pnand %p231_p13, %p225_p10 }
  0x25   :  { %177 = vmatmul.mubr.msk.f32.vlgmr.msra.gmra.mxu0 %vm56_vm0, %v44_v5 }
  0xe5   :  { %v178_v7 = vpop.f32.mrf.mxu0 }
  0xe6   :  { %v135_v8 = vadd.f32 %v178_v7, %v159_v6 }
  0xe7   :  { %v129_v9 = vpop.f32.mrf.mxu0 }
  0xe8   :  { %v130_v10 = vadd.f32 %v159_v6, %v129_v9  ;;  %140 = vst.msk [vmem:[#allocation7 + $0x8] sm:$0xff] %vm138_vm1, %v135_v8 }
  0xea   :  { %139 = vst.msk [vmem:[#allocation7] sm:$0xff] %vm138_vm1, %v130_v10 }
  0xeb   :  { %235 = shalt.err (!%p232_p0)
}
  0xec   :  { %152 = dma.vmem_to_hbm [thread:$0]  %s147_s25, 256, %s301_s3, [#allocation4], %s251_s15, %s251_s15, %s252_s16  }
  0xed   :  { %248 = dma.done.wait [#allocation4], 256  }
  0xee   :  { %249 = vsyncadd [#allocation4], 4294967040 }
  0xef   :  { %156 = vsyncpa [#allocation3], 1 }
  0xf0   :  { %157 = vsyncpa [#allocation6], 1 }
  0xf1   :  { %158 = vsyncpa [#allocation4], 1 }

</bundles_post_ra>
